<compile_context>
chip_gen: v5e
topology: v5e:2x2
jax: 0.10.0
libtpu: 0.0.40
codegen_flags: <defaults>
</compile_context>

<pallas_src>
from functools import partial

import jax
import jax.numpy as jnp
from jax import lax
from jax.experimental import pallas as pl
from jax.experimental.pallas import tpu as pltpu


def lm_kernel(B, L, len_ref, idx_ref, emb_ref, wih_ref, whh_ref, b_rnn_ref,
              wout_ref, b_out_ref, o_ref):
    """Fused embedding + RNN + output projection for the whole (B, L) batch.

    B, L:       static Python ints (bound via functools.partial)
    len_ref:    (B,)      int32 lengths (SMEM, scalar-prefetched)
    idx_ref:    (B*L, 1)  int32 token ids, batch-major rows (row = b*L + t)
    emb_ref:    (V, E)    embedding table
    wih_ref:    (E, H)    input->hidden weight (already transposed)
    whh_ref:    (H, H)    hidden->hidden weight (already transposed)
    b_rnn_ref:  (1, H)    b_ih + b_hh
    wout_ref:   (H, V)    output projection weight (already transposed)
    b_out_ref:  (1, V)    output projection bias
    o_ref:      (B*L, V)  logits, batch-major rows
    """
    R = B * L
    V, E = emb_ref.shape
    H = whh_ref.shape[0]

    # ---- Fused embedding gather: one-hot (R, V) @ emb (V, E) on the MXU ----
    idx_col = idx_ref[...]                                       # (R, 1) int32
    v_iota = lax.broadcasted_iota(jnp.int32, (R, V), 1)
    onehot = (v_iota == idx_col).astype(jnp.float32)             # (R, V)
    x_flat = jnp.dot(onehot, emb_ref[...],
                     preferred_element_type=jnp.float32)         # (R, E)

    # ---- Hoisted input projection + bias: one (R, E) @ (E, H) MXU push ----
    xh = (jnp.dot(x_flat, wih_ref[...],
                  preferred_element_type=jnp.float32)
          + b_rnn_ref[...])                                      # (R, H)

    whh = whh_ref[...]                                           # (H, H)

    # ---- Sequential recurrence, unrolled per batch row (independent chains;
    #      the scheduler interleaves them under the serial MXU latency) ----
    hist_chunks = []
    for b in range(B):                                  # B static & tiny
        xh_b = xh[b * L:(b + 1) * L, :]                 # (L, H) aligned slice
        h = jnp.zeros((1, H), jnp.float32)
        outs_b = []
        for t in range(L):                              # static L -> unrolled
            h_new = jnp.tanh(xh_b[t:t + 1, :]
                             + jnp.dot(h, whh,
                                       preferred_element_type=jnp.float32))
            # Packed-sequence validity: scalar mask from the SMEM length.
            m = (len_ref[b] > t).astype(jnp.float32)    # traced 0.0 / 1.0
            h = m * h_new + (1.0 - m) * h               # padded: h unchanged
            outs_b.append(m * h_new)                    # padded: output is 0
        hist_chunks.append(jnp.concatenate(outs_b, axis=0))      # (L, H)
    hist = jnp.concatenate(hist_chunks, axis=0)                  # (R, H)

    # ---- Hoisted output projection: one (R, H) @ (H, V) matmul and a single
    #      dense, unmasked (16, 128) store ----
    o_ref[...] = (jnp.dot(hist, wout_ref[...],
                          preferred_element_type=jnp.float32)
                  + b_out_ref[...])


def language_model_forward(indices, lengths, params):
    """indices: (B, L) int32, lengths: (B,) int -> logits (B, L, V).

    Returns full-length logits (positions t >= lengths[b] carry logits equal
    to b_out).  pad_packed_sequence's truncation to max(lengths) is a static
    slice left to the caller so this wrapper stays jittable (no host sync).
    """
    B, L = indices.shape
    V, E = params["emb"].shape
    H = params["whh"].shape[0]

    # Free contiguous flatten: batch-major rows (row = b*L + t).
    idx_col = indices.astype(jnp.int32).reshape(B * L, 1)
    lengths = lengths.astype(jnp.int32)

    out_flat = pl.pallas_call(
        partial(lm_kernel, B, L),
        out_shape=jax.ShapeDtypeStruct((B * L, V), jnp.float32),
        grid_spec=pltpu.PrefetchScalarGridSpec(
            num_scalar_prefetch=1,
            grid=(1,),                                    # single fused step
            in_specs=[
                pl.BlockSpec((B * L, 1), lambda i, lens: (0, 0)),  # token ids
                pl.BlockSpec((V, E),     lambda i, lens: (0, 0)),  # emb table
                pl.BlockSpec((E, H),     lambda i, lens: (0, 0)),  # W_ih^T
                pl.BlockSpec((H, H),     lambda i, lens: (0, 0)),  # W_hh^T
                pl.BlockSpec((1, H),     lambda i, lens: (0, 0)),  # b_ih+b_hh
                pl.BlockSpec((H, V),     lambda i, lens: (0, 0)),  # W_out^T
                pl.BlockSpec((1, V),     lambda i, lens: (0, 0)),  # b_out
            ],
            out_specs=pl.BlockSpec((B * L, V), lambda i, lens: (0, 0)),
        ),
        compiler_params=pltpu.CompilerParams(
            dimension_semantics=("arbitrary",)),
    )(lengths, idx_col, params["emb"], params["wih"], params["whh"],
      params["b_rnn"], params["wout"], params["b_out"])

    # Batch-major rows -> (B, L, V) is a free contiguous view (no transpose).
    return out_flat.reshape(B, L, V)


def ref_forward(indices, lengths, params):
    """Pure-JAX reference replicating packed-RNN forward semantics (full L)."""
    emb = jnp.take(params["emb"], indices, axis=0).astype(jnp.float32)
    B, L, _ = emb.shape
    H = params["whh"].shape[0]
    hp = lax.Precision.HIGHEST
    h = jnp.zeros((B, H), jnp.float32)
    outs = []
    for t in range(L):
        pre = (jnp.dot(emb[:, t], params["wih"], precision=hp)
               + jnp.dot(h, params["whh"], precision=hp)
               + params["b_rnn"])
        h_new = jnp.tanh(pre)
        valid = (t < lengths)[:, None]
        h = jnp.where(valid, h_new, h)
        outs.append(jnp.where(valid, h_new, 0.0))
    out = jnp.stack(outs, axis=1)                                 # (B, L, H)
    return jnp.dot(out, params["wout"], precision=hp) + params["b_out"]


def make_params(vocab_size, embed_size, hidden_size):
    key = jax.random.PRNGKey(0)
    ks = jax.random.split(key, 7)
    s = 1.0 / jnp.sqrt(hidden_size)
    return {
        "emb":   jax.random.normal(ks[0], (vocab_size, embed_size), jnp.float32),
        "wih":   jax.random.uniform(ks[1], (embed_size, hidden_size), jnp.float32, -s, s),
        "whh":   jax.random.uniform(ks[2], (hidden_size, hidden_size), jnp.float32, -s, s),
        "b_rnn": jax.random.uniform(ks[3], (1, hidden_size), jnp.float32, -s, s)
                 + jax.random.uniform(ks[4], (1, hidden_size), jnp.float32, -s, s),
        "wout":  jax.random.uniform(ks[5], (hidden_size, vocab_size), jnp.float32, -s, s),
        "b_out": jax.random.uniform(ks[6], (1, vocab_size), jnp.float32, -s, s),
    }


if __name__ == "__main__":
    # Small shapes consistent with the module: B=2, L=8, E=32, H=32, V=128.
    B, L, E, H, V = 2, 8, 32, 32, 128
    params = make_params(V, E, H)

    key = jax.random.PRNGKey(0)
    indices = jax.random.randint(key, (B, L), 0, V, dtype=jnp.int32)
    lengths = jnp.array([6, 4], dtype=jnp.int32)   # exercises packing semantics

    fwd = jax.jit(language_model_forward)
    logits = jax.block_until_ready(fwd(indices, lengths, params))

    ref = ref_forward(indices, lengths, params)
    assert logits.shape == (B, L, V)
    assert jnp.allclose(logits, ref, atol=1e-3, rtol=1e-3)
    # Packed-sequence semantics: padded positions carry exactly the output bias.
    assert jnp.allclose(logits[1, 4:],
                        jnp.broadcast_to(params["b_out"], (L - 4, V)),
                        atol=1e-5, rtol=1e-5)

    # pad_packed_sequence truncation to max(lengths) (static, outside the jit):
    _ = logits[:, :int(lengths.max())]

    # TODO(synk): inference() (autoregressive multinomial sampling loop) is a
    # host-side generation loop and is not implemented as a kernel.
    print("KERNEL_OK")
</pallas_src>

<mosaic_0001>
module attributes {stable_mosaic.version = 11 : i64} {
  func.func @lm_kernel(%arg0: i32, %arg1: memref<2xi32, #tpu.memory_space<smem>>, %arg2: memref<16x1xi32, #tpu.memory_space<vmem>>, %arg3: memref<128x32xf32, #tpu.memory_space<vmem>>, %arg4: memref<32x32xf32, #tpu.memory_space<vmem>>, %arg5: memref<32x32xf32, #tpu.memory_space<vmem>>, %arg6: memref<1x32xf32, #tpu.memory_space<vmem>>, %arg7: memref<32x128xf32, #tpu.memory_space<vmem>>, %arg8: memref<1x128xf32, #tpu.memory_space<vmem>>, %arg9: memref<16x128xf32, #tpu.memory_space<vmem>>) attributes {dimension_semantics = [#tpu.dimension_semantics<arbitrary>], iteration_bounds = array<i64: 1>, scalar_prefetch = 1 : i64, scratch_operands = 0 : i64, tpu.core_type = #tpu.core_type<tc>, window_params = [{pipeline_mode = #tpu.pipeline_mode<synchronous>, transform_indices = @transform_0, window_bounds = array<i64: 16, 1>}, {pipeline_mode = #tpu.pipeline_mode<synchronous>, transform_indices = @transform_1, window_bounds = array<i64: 128, 32>}, {pipeline_mode = #tpu.pipeline_mode<synchronous>, transform_indices = @transform_2, window_bounds = array<i64: 32, 32>}, {pipeline_mode = #tpu.pipeline_mode<synchronous>, transform_indices = @transform_3, window_bounds = array<i64: 32, 32>}, {pipeline_mode = #tpu.pipeline_mode<synchronous>, transform_indices = @transform_4, window_bounds = array<i64: 1, 32>}, {pipeline_mode = #tpu.pipeline_mode<synchronous>, transform_indices = @transform_5, window_bounds = array<i64: 32, 128>}, {pipeline_mode = #tpu.pipeline_mode<synchronous>, transform_indices = @transform_6, window_bounds = array<i64: 1, 128>}, {pipeline_mode = #tpu.pipeline_mode<synchronous>, transform_indices = @transform_7, window_bounds = array<i64: 16, 128>}]} {
    %c0 = arith.constant 0 : index
    %c0_0 = arith.constant 0 : index
    %0 = vector.load %arg2[%c0, %c0_0] : memref<16x1xi32, #tpu.memory_space<vmem>>, vector<16x1xi32>
    %1 = tpu.iota {dimensions = array<i32: 1>} : vector<16x128xi32>
    %2 = vector.broadcast %0 : vector<16x1xi32> to vector<16x128xi32>
    %3 = arith.cmpi eq, %1, %2 : vector<16x128xi32>
    %4 = arith.extui %3 : vector<16x128xi1> to vector<16x128xi32>
    %5 = arith.sitofp %4 : vector<16x128xi32> to vector<16x128xf32>
    %c0_1 = arith.constant 0 : index
    %c0_2 = arith.constant 0 : index
    %6 = vector.load %arg3[%c0_1, %c0_2] : memref<128x32xf32, #tpu.memory_space<vmem>>, vector<128x32xf32>
    %cst = arith.constant dense<0.000000e+00> : vector<16x32xf32>
    %7 = tpu.matmul %5, %6, %cst {dimension_numbers = #tpu.dot_dimension_numbers<[1], [0], [0], [1], [0, 0, 1, 1], [], []>} : vector<16x128xf32>, vector<128x32xf32>, vector<16x32xf32> -> vector<16x32xf32>
    %c0_3 = arith.constant 0 : index
    %c0_4 = arith.constant 0 : index
    %8 = vector.load %arg4[%c0_3, %c0_4] : memref<32x32xf32, #tpu.memory_space<vmem>>, vector<32x32xf32>
    %cst_5 = arith.constant dense<0.000000e+00> : vector<16x32xf32>
    %9 = tpu.matmul %7, %8, %cst_5 {dimension_numbers = #tpu.dot_dimension_numbers<[1], [0], [0], [1], [0, 0, 1, 1], [], []>} : vector<16x32xf32>, vector<32x32xf32>, vector<16x32xf32> -> vector<16x32xf32>
    %c0_6 = arith.constant 0 : index
    %c0_7 = arith.constant 0 : index
    %10 = vector.load %arg6[%c0_6, %c0_7] : memref<1x32xf32, #tpu.memory_space<vmem>>, vector<1x32xf32>
    %11 = vector.broadcast %10 : vector<1x32xf32> to vector<16x32xf32>
    %12 = arith.addf %9, %11 : vector<16x32xf32>
    %c0_8 = arith.constant 0 : index
    %c0_9 = arith.constant 0 : index
    %13 = vector.load %arg5[%c0_8, %c0_9] : memref<32x32xf32, #tpu.memory_space<vmem>>, vector<32x32xf32>
    %14 = vector.extract_strided_slice %12 {offsets = [0, 0], sizes = [8, 32], strides = [1, 1]} : vector<16x32xf32> to vector<8x32xf32>
    %cst_10 = arith.constant 0.000000e+00 : f32
    %15 = vector.broadcast %cst_10 : f32 to vector<1x32xf32>
    %16 = vector.extract_strided_slice %14 {offsets = [0, 0], sizes = [1, 32], strides = [1, 1]} : vector<8x32xf32> to vector<1x32xf32>
    %cst_11 = arith.constant dense<0.000000e+00> : vector<1x32xf32>
    %17 = tpu.matmul %15, %13, %cst_11 {dimension_numbers = #tpu.dot_dimension_numbers<[1], [0], [0], [1], [0, 0, 1, 1], [], []>} : vector<1x32xf32>, vector<32x32xf32>, vector<1x32xf32> -> vector<1x32xf32>
    %18 = arith.addf %16, %17 : vector<1x32xf32>
    %19 = math.tanh %18 : vector<1x32xf32>
    %c0_12 = arith.constant 0 : index
    %20 = memref.load %arg1[%c0_12] : memref<2xi32, #tpu.memory_space<smem>>
    %c0_i32 = arith.constant 0 : i32
    %21 = arith.cmpi sgt, %20, %c0_i32 : i32
    %22 = arith.extui %21 : i1 to i32
    %23 = arith.sitofp %22 : i32 to f32
    %24 = vector.broadcast %23 : f32 to vector<1x32xf32>
    %25 = arith.mulf %24, %19 : vector<1x32xf32>
    %cst_13 = arith.constant 1.000000e+00 : f32
    %26 = arith.subf %cst_13, %23 : f32
    %27 = vector.broadcast %26 : f32 to vector<1x32xf32>
    %28 = arith.mulf %27, %15 : vector<1x32xf32>
    %29 = arith.addf %25, %28 : vector<1x32xf32>
    %30 = vector.broadcast %23 : f32 to vector<1x32xf32>
    %31 = arith.mulf %30, %19 : vector<1x32xf32>
    %32 = vector.extract_strided_slice %14 {offsets = [1, 0], sizes = [1, 32], strides = [1, 1]} : vector<8x32xf32> to vector<1x32xf32>
    %cst_14 = arith.constant dense<0.000000e+00> : vector<1x32xf32>
    %33 = tpu.matmul %29, %13, %cst_14 {dimension_numbers = #tpu.dot_dimension_numbers<[1], [0], [0], [1], [0, 0, 1, 1], [], []>} : vector<1x32xf32>, vector<32x32xf32>, vector<1x32xf32> -> vector<1x32xf32>
    %34 = arith.addf %32, %33 : vector<1x32xf32>
    %35 = math.tanh %34 : vector<1x32xf32>
    %c0_15 = arith.constant 0 : index
    %36 = memref.load %arg1[%c0_15] : memref<2xi32, #tpu.memory_space<smem>>
    %c1_i32 = arith.constant 1 : i32
    %37 = arith.cmpi sgt, %36, %c1_i32 : i32
    %38 = arith.extui %37 : i1 to i32
    %39 = arith.sitofp %38 : i32 to f32
    %40 = vector.broadcast %39 : f32 to vector<1x32xf32>
    %41 = arith.mulf %40, %35 : vector<1x32xf32>
    %cst_16 = arith.constant 1.000000e+00 : f32
    %42 = arith.subf %cst_16, %39 : f32
    %43 = vector.broadcast %42 : f32 to vector<1x32xf32>
    %44 = arith.mulf %43, %29 : vector<1x32xf32>
    %45 = arith.addf %41, %44 : vector<1x32xf32>
    %46 = vector.broadcast %39 : f32 to vector<1x32xf32>
    %47 = arith.mulf %46, %35 : vector<1x32xf32>
    %48 = vector.extract_strided_slice %14 {offsets = [2, 0], sizes = [1, 32], strides = [1, 1]} : vector<8x32xf32> to vector<1x32xf32>
    %cst_17 = arith.constant dense<0.000000e+00> : vector<1x32xf32>
    %49 = tpu.matmul %45, %13, %cst_17 {dimension_numbers = #tpu.dot_dimension_numbers<[1], [0], [0], [1], [0, 0, 1, 1], [], []>} : vector<1x32xf32>, vector<32x32xf32>, vector<1x32xf32> -> vector<1x32xf32>
    %50 = arith.addf %48, %49 : vector<1x32xf32>
    %51 = math.tanh %50 : vector<1x32xf32>
    %c0_18 = arith.constant 0 : index
    %52 = memref.load %arg1[%c0_18] : memref<2xi32, #tpu.memory_space<smem>>
    %c2_i32 = arith.constant 2 : i32
    %53 = arith.cmpi sgt, %52, %c2_i32 : i32
    %54 = arith.extui %53 : i1 to i32
    %55 = arith.sitofp %54 : i32 to f32
    %56 = vector.broadcast %55 : f32 to vector<1x32xf32>
    %57 = arith.mulf %56, %51 : vector<1x32xf32>
    %cst_19 = arith.constant 1.000000e+00 : f32
    %58 = arith.subf %cst_19, %55 : f32
    %59 = vector.broadcast %58 : f32 to vector<1x32xf32>
    %60 = arith.mulf %59, %45 : vector<1x32xf32>
    %61 = arith.addf %57, %60 : vector<1x32xf32>
    %62 = vector.broadcast %55 : f32 to vector<1x32xf32>
    %63 = arith.mulf %62, %51 : vector<1x32xf32>
    %64 = vector.extract_strided_slice %14 {offsets = [3, 0], sizes = [1, 32], strides = [1, 1]} : vector<8x32xf32> to vector<1x32xf32>
    %cst_20 = arith.constant dense<0.000000e+00> : vector<1x32xf32>
    %65 = tpu.matmul %61, %13, %cst_20 {dimension_numbers = #tpu.dot_dimension_numbers<[1], [0], [0], [1], [0, 0, 1, 1], [], []>} : vector<1x32xf32>, vector<32x32xf32>, vector<1x32xf32> -> vector<1x32xf32>
    %66 = arith.addf %64, %65 : vector<1x32xf32>
    %67 = math.tanh %66 : vector<1x32xf32>
    %c0_21 = arith.constant 0 : index
    %68 = memref.load %arg1[%c0_21] : memref<2xi32, #tpu.memory_space<smem>>
    %c3_i32 = arith.constant 3 : i32
    %69 = arith.cmpi sgt, %68, %c3_i32 : i32
    %70 = arith.extui %69 : i1 to i32
    %71 = arith.sitofp %70 : i32 to f32
    %72 = vector.broadcast %71 : f32 to vector<1x32xf32>
    %73 = arith.mulf %72, %67 : vector<1x32xf32>
    %cst_22 = arith.constant 1.000000e+00 : f32
    %74 = arith.subf %cst_22, %71 : f32
    %75 = vector.broadcast %74 : f32 to vector<1x32xf32>
    %76 = arith.mulf %75, %61 : vector<1x32xf32>
    %77 = arith.addf %73, %76 : vector<1x32xf32>
    %78 = vector.broadcast %71 : f32 to vector<1x32xf32>
    %79 = arith.mulf %78, %67 : vector<1x32xf32>
    %80 = vector.extract_strided_slice %14 {offsets = [4, 0], sizes = [1, 32], strides = [1, 1]} : vector<8x32xf32> to vector<1x32xf32>
    %cst_23 = arith.constant dense<0.000000e+00> : vector<1x32xf32>
    %81 = tpu.matmul %77, %13, %cst_23 {dimension_numbers = #tpu.dot_dimension_numbers<[1], [0], [0], [1], [0, 0, 1, 1], [], []>} : vector<1x32xf32>, vector<32x32xf32>, vector<1x32xf32> -> vector<1x32xf32>
    %82 = arith.addf %80, %81 : vector<1x32xf32>
    %83 = math.tanh %82 : vector<1x32xf32>
    %c0_24 = arith.constant 0 : index
    %84 = memref.load %arg1[%c0_24] : memref<2xi32, #tpu.memory_space<smem>>
    %c4_i32 = arith.constant 4 : i32
    %85 = arith.cmpi sgt, %84, %c4_i32 : i32
    %86 = arith.extui %85 : i1 to i32
    %87 = arith.sitofp %86 : i32 to f32
    %88 = vector.broadcast %87 : f32 to vector<1x32xf32>
    %89 = arith.mulf %88, %83 : vector<1x32xf32>
    %cst_25 = arith.constant 1.000000e+00 : f32
    %90 = arith.subf %cst_25, %87 : f32
    %91 = vector.broadcast %90 : f32 to vector<1x32xf32>
    %92 = arith.mulf %91, %77 : vector<1x32xf32>
    %93 = arith.addf %89, %92 : vector<1x32xf32>
    %94 = vector.broadcast %87 : f32 to vector<1x32xf32>
    %95 = arith.mulf %94, %83 : vector<1x32xf32>
    %96 = vector.extract_strided_slice %14 {offsets = [5, 0], sizes = [1, 32], strides = [1, 1]} : vector<8x32xf32> to vector<1x32xf32>
    %cst_26 = arith.constant dense<0.000000e+00> : vector<1x32xf32>
    %97 = tpu.matmul %93, %13, %cst_26 {dimension_numbers = #tpu.dot_dimension_numbers<[1], [0], [0], [1], [0, 0, 1, 1], [], []>} : vector<1x32xf32>, vector<32x32xf32>, vector<1x32xf32> -> vector<1x32xf32>
    %98 = arith.addf %96, %97 : vector<1x32xf32>
    %99 = math.tanh %98 : vector<1x32xf32>
    %c0_27 = arith.constant 0 : index
    %100 = memref.load %arg1[%c0_27] : memref<2xi32, #tpu.memory_space<smem>>
    %c5_i32 = arith.constant 5 : i32
    %101 = arith.cmpi sgt, %100, %c5_i32 : i32
    %102 = arith.extui %101 : i1 to i32
    %103 = arith.sitofp %102 : i32 to f32
    %104 = vector.broadcast %103 : f32 to vector<1x32xf32>
    %105 = arith.mulf %104, %99 : vector<1x32xf32>
    %cst_28 = arith.constant 1.000000e+00 : f32
    %106 = arith.subf %cst_28, %103 : f32
    %107 = vector.broadcast %106 : f32 to vector<1x32xf32>
    %108 = arith.mulf %107, %93 : vector<1x32xf32>
    %109 = arith.addf %105, %108 : vector<1x32xf32>
    %110 = vector.broadcast %103 : f32 to vector<1x32xf32>
    %111 = arith.mulf %110, %99 : vector<1x32xf32>
    %112 = vector.extract_strided_slice %14 {offsets = [6, 0], sizes = [1, 32], strides = [1, 1]} : vector<8x32xf32> to vector<1x32xf32>
    %cst_29 = arith.constant dense<0.000000e+00> : vector<1x32xf32>
    %113 = tpu.matmul %109, %13, %cst_29 {dimension_numbers = #tpu.dot_dimension_numbers<[1], [0], [0], [1], [0, 0, 1, 1], [], []>} : vector<1x32xf32>, vector<32x32xf32>, vector<1x32xf32> -> vector<1x32xf32>
    %114 = arith.addf %112, %113 : vector<1x32xf32>
    %115 = math.tanh %114 : vector<1x32xf32>
    %c0_30 = arith.constant 0 : index
    %116 = memref.load %arg1[%c0_30] : memref<2xi32, #tpu.memory_space<smem>>
    %c6_i32 = arith.constant 6 : i32
    %117 = arith.cmpi sgt, %116, %c6_i32 : i32
    %118 = arith.extui %117 : i1 to i32
    %119 = arith.sitofp %118 : i32 to f32
    %120 = vector.broadcast %119 : f32 to vector<1x32xf32>
    %121 = arith.mulf %120, %115 : vector<1x32xf32>
    %cst_31 = arith.constant 1.000000e+00 : f32
    %122 = arith.subf %cst_31, %119 : f32
    %123 = vector.broadcast %122 : f32 to vector<1x32xf32>
    %124 = arith.mulf %123, %109 : vector<1x32xf32>
    %125 = arith.addf %121, %124 : vector<1x32xf32>
    %126 = vector.broadcast %119 : f32 to vector<1x32xf32>
    %127 = arith.mulf %126, %115 : vector<1x32xf32>
    %128 = vector.extract_strided_slice %14 {offsets = [7, 0], sizes = [1, 32], strides = [1, 1]} : vector<8x32xf32> to vector<1x32xf32>
    %cst_32 = arith.constant dense<0.000000e+00> : vector<1x32xf32>
    %129 = tpu.matmul %125, %13, %cst_32 {dimension_numbers = #tpu.dot_dimension_numbers<[1], [0], [0], [1], [0, 0, 1, 1], [], []>} : vector<1x32xf32>, vector<32x32xf32>, vector<1x32xf32> -> vector<1x32xf32>
    %130 = arith.addf %128, %129 : vector<1x32xf32>
    %131 = math.tanh %130 : vector<1x32xf32>
    %c0_33 = arith.constant 0 : index
    %132 = memref.load %arg1[%c0_33] : memref<2xi32, #tpu.memory_space<smem>>
    %c7_i32 = arith.constant 7 : i32
    %133 = arith.cmpi sgt, %132, %c7_i32 : i32
    %134 = arith.extui %133 : i1 to i32
    %135 = arith.sitofp %134 : i32 to f32
    %136 = vector.broadcast %135 : f32 to vector<1x32xf32>
    %137 = arith.mulf %136, %131 : vector<1x32xf32>
    %138 = tpu.concatenate %31, %47, %63, %79, %95, %111, %127, %137 in 0 : vector<1x32xf32>, vector<1x32xf32>, vector<1x32xf32>, vector<1x32xf32>, vector<1x32xf32>, vector<1x32xf32>, vector<1x32xf32>, vector<1x32xf32> -> vector<8x32xf32>
    %139 = vector.extract_strided_slice %12 {offsets = [8, 0], sizes = [8, 32], strides = [1, 1]} : vector<16x32xf32> to vector<8x32xf32>
    %cst_34 = arith.constant 0.000000e+00 : f32
    %140 = vector.broadcast %cst_34 : f32 to vector<1x32xf32>
    %141 = vector.extract_strided_slice %139 {offsets = [0, 0], sizes = [1, 32], strides = [1, 1]} : vector<8x32xf32> to vector<1x32xf32>
    %cst_35 = arith.constant dense<0.000000e+00> : vector<1x32xf32>
    %142 = tpu.matmul %140, %13, %cst_35 {dimension_numbers = #tpu.dot_dimension_numbers<[1], [0], [0], [1], [0, 0, 1, 1], [], []>} : vector<1x32xf32>, vector<32x32xf32>, vector<1x32xf32> -> vector<1x32xf32>
    %143 = arith.addf %141, %142 : vector<1x32xf32>
    %144 = math.tanh %143 : vector<1x32xf32>
    %c1 = arith.constant 1 : index
    %145 = memref.load %arg1[%c1] : memref<2xi32, #tpu.memory_space<smem>>
    %c0_i32_36 = arith.constant 0 : i32
    %146 = arith.cmpi sgt, %145, %c0_i32_36 : i32
    %147 = arith.extui %146 : i1 to i32
    %148 = arith.sitofp %147 : i32 to f32
    %149 = vector.broadcast %148 : f32 to vector<1x32xf32>
    %150 = arith.mulf %149, %144 : vector<1x32xf32>
    %cst_37 = arith.constant 1.000000e+00 : f32
    %151 = arith.subf %cst_37, %148 : f32
    %152 = vector.broadcast %151 : f32 to vector<1x32xf32>
    %153 = arith.mulf %152, %140 : vector<1x32xf32>
    %154 = arith.addf %150, %153 : vector<1x32xf32>
    %155 = vector.broadcast %148 : f32 to vector<1x32xf32>
    %156 = arith.mulf %155, %144 : vector<1x32xf32>
    %157 = vector.extract_strided_slice %139 {offsets = [1, 0], sizes = [1, 32], strides = [1, 1]} : vector<8x32xf32> to vector<1x32xf32>
    %cst_38 = arith.constant dense<0.000000e+00> : vector<1x32xf32>
    %158 = tpu.matmul %154, %13, %cst_38 {dimension_numbers = #tpu.dot_dimension_numbers<[1], [0], [0], [1], [0, 0, 1, 1], [], []>} : vector<1x32xf32>, vector<32x32xf32>, vector<1x32xf32> -> vector<1x32xf32>
    %159 = arith.addf %157, %158 : vector<1x32xf32>
    %160 = math.tanh %159 : vector<1x32xf32>
    %c1_39 = arith.constant 1 : index
    %161 = memref.load %arg1[%c1_39] : memref<2xi32, #tpu.memory_space<smem>>
    %c1_i32_40 = arith.constant 1 : i32
    %162 = arith.cmpi sgt, %161, %c1_i32_40 : i32
    %163 = arith.extui %162 : i1 to i32
    %164 = arith.sitofp %163 : i32 to f32
    %165 = vector.broadcast %164 : f32 to vector<1x32xf32>
    %166 = arith.mulf %165, %160 : vector<1x32xf32>
    %cst_41 = arith.constant 1.000000e+00 : f32
    %167 = arith.subf %cst_41, %164 : f32
    %168 = vector.broadcast %167 : f32 to vector<1x32xf32>
    %169 = arith.mulf %168, %154 : vector<1x32xf32>
    %170 = arith.addf %166, %169 : vector<1x32xf32>
    %171 = vector.broadcast %164 : f32 to vector<1x32xf32>
    %172 = arith.mulf %171, %160 : vector<1x32xf32>
    %173 = vector.extract_strided_slice %139 {offsets = [2, 0], sizes = [1, 32], strides = [1, 1]} : vector<8x32xf32> to vector<1x32xf32>
    %cst_42 = arith.constant dense<0.000000e+00> : vector<1x32xf32>
    %174 = tpu.matmul %170, %13, %cst_42 {dimension_numbers = #tpu.dot_dimension_numbers<[1], [0], [0], [1], [0, 0, 1, 1], [], []>} : vector<1x32xf32>, vector<32x32xf32>, vector<1x32xf32> -> vector<1x32xf32>
    %175 = arith.addf %173, %174 : vector<1x32xf32>
    %176 = math.tanh %175 : vector<1x32xf32>
    %c1_43 = arith.constant 1 : index
    %177 = memref.load %arg1[%c1_43] : memref<2xi32, #tpu.memory_space<smem>>
    %c2_i32_44 = arith.constant 2 : i32
    %178 = arith.cmpi sgt, %177, %c2_i32_44 : i32
    %179 = arith.extui %178 : i1 to i32
    %180 = arith.sitofp %179 : i32 to f32
    %181 = vector.broadcast %180 : f32 to vector<1x32xf32>
    %182 = arith.mulf %181, %176 : vector<1x32xf32>
    %cst_45 = arith.constant 1.000000e+00 : f32
    %183 = arith.subf %cst_45, %180 : f32
    %184 = vector.broadcast %183 : f32 to vector<1x32xf32>
    %185 = arith.mulf %184, %170 : vector<1x32xf32>
    %186 = arith.addf %182, %185 : vector<1x32xf32>
    %187 = vector.broadcast %180 : f32 to vector<1x32xf32>
    %188 = arith.mulf %187, %176 : vector<1x32xf32>
    %189 = vector.extract_strided_slice %139 {offsets = [3, 0], sizes = [1, 32], strides = [1, 1]} : vector<8x32xf32> to vector<1x32xf32>
    %cst_46 = arith.constant dense<0.000000e+00> : vector<1x32xf32>
    %190 = tpu.matmul %186, %13, %cst_46 {dimension_numbers = #tpu.dot_dimension_numbers<[1], [0], [0], [1], [0, 0, 1, 1], [], []>} : vector<1x32xf32>, vector<32x32xf32>, vector<1x32xf32> -> vector<1x32xf32>
    %191 = arith.addf %189, %190 : vector<1x32xf32>
    %192 = math.tanh %191 : vector<1x32xf32>
    %c1_47 = arith.constant 1 : index
    %193 = memref.load %arg1[%c1_47] : memref<2xi32, #tpu.memory_space<smem>>
    %c3_i32_48 = arith.constant 3 : i32
    %194 = arith.cmpi sgt, %193, %c3_i32_48 : i32
    %195 = arith.extui %194 : i1 to i32
    %196 = arith.sitofp %195 : i32 to f32
    %197 = vector.broadcast %196 : f32 to vector<1x32xf32>
    %198 = arith.mulf %197, %192 : vector<1x32xf32>
    %cst_49 = arith.constant 1.000000e+00 : f32
    %199 = arith.subf %cst_49, %196 : f32
    %200 = vector.broadcast %199 : f32 to vector<1x32xf32>
    %201 = arith.mulf %200, %186 : vector<1x32xf32>
    %202 = arith.addf %198, %201 : vector<1x32xf32>
    %203 = vector.broadcast %196 : f32 to vector<1x32xf32>
    %204 = arith.mulf %203, %192 : vector<1x32xf32>
    %205 = vector.extract_strided_slice %139 {offsets = [4, 0], sizes = [1, 32], strides = [1, 1]} : vector<8x32xf32> to vector<1x32xf32>
    %cst_50 = arith.constant dense<0.000000e+00> : vector<1x32xf32>
    %206 = tpu.matmul %202, %13, %cst_50 {dimension_numbers = #tpu.dot_dimension_numbers<[1], [0], [0], [1], [0, 0, 1, 1], [], []>} : vector<1x32xf32>, vector<32x32xf32>, vector<1x32xf32> -> vector<1x32xf32>
    %207 = arith.addf %205, %206 : vector<1x32xf32>
    %208 = math.tanh %207 : vector<1x32xf32>
    %c1_51 = arith.constant 1 : index
    %209 = memref.load %arg1[%c1_51] : memref<2xi32, #tpu.memory_space<smem>>
    %c4_i32_52 = arith.constant 4 : i32
    %210 = arith.cmpi sgt, %209, %c4_i32_52 : i32
    %211 = arith.extui %210 : i1 to i32
    %212 = arith.sitofp %211 : i32 to f32
    %213 = vector.broadcast %212 : f32 to vector<1x32xf32>
    %214 = arith.mulf %213, %208 : vector<1x32xf32>
    %cst_53 = arith.constant 1.000000e+00 : f32
    %215 = arith.subf %cst_53, %212 : f32
    %216 = vector.broadcast %215 : f32 to vector<1x32xf32>
    %217 = arith.mulf %216, %202 : vector<1x32xf32>
    %218 = arith.addf %214, %217 : vector<1x32xf32>
    %219 = vector.broadcast %212 : f32 to vector<1x32xf32>
    %220 = arith.mulf %219, %208 : vector<1x32xf32>
    %221 = vector.extract_strided_slice %139 {offsets = [5, 0], sizes = [1, 32], strides = [1, 1]} : vector<8x32xf32> to vector<1x32xf32>
    %cst_54 = arith.constant dense<0.000000e+00> : vector<1x32xf32>
    %222 = tpu.matmul %218, %13, %cst_54 {dimension_numbers = #tpu.dot_dimension_numbers<[1], [0], [0], [1], [0, 0, 1, 1], [], []>} : vector<1x32xf32>, vector<32x32xf32>, vector<1x32xf32> -> vector<1x32xf32>
    %223 = arith.addf %221, %222 : vector<1x32xf32>
    %224 = math.tanh %223 : vector<1x32xf32>
    %c1_55 = arith.constant 1 : index
    %225 = memref.load %arg1[%c1_55] : memref<2xi32, #tpu.memory_space<smem>>
    %c5_i32_56 = arith.constant 5 : i32
    %226 = arith.cmpi sgt, %225, %c5_i32_56 : i32
    %227 = arith.extui %226 : i1 to i32
    %228 = arith.sitofp %227 : i32 to f32
    %229 = vector.broadcast %228 : f32 to vector<1x32xf32>
    %230 = arith.mulf %229, %224 : vector<1x32xf32>
    %cst_57 = arith.constant 1.000000e+00 : f32
    %231 = arith.subf %cst_57, %228 : f32
    %232 = vector.broadcast %231 : f32 to vector<1x32xf32>
    %233 = arith.mulf %232, %218 : vector<1x32xf32>
    %234 = arith.addf %230, %233 : vector<1x32xf32>
    %235 = vector.broadcast %228 : f32 to vector<1x32xf32>
    %236 = arith.mulf %235, %224 : vector<1x32xf32>
    %237 = vector.extract_strided_slice %139 {offsets = [6, 0], sizes = [1, 32], strides = [1, 1]} : vector<8x32xf32> to vector<1x32xf32>
    %cst_58 = arith.constant dense<0.000000e+00> : vector<1x32xf32>
    %238 = tpu.matmul %234, %13, %cst_58 {dimension_numbers = #tpu.dot_dimension_numbers<[1], [0], [0], [1], [0, 0, 1, 1], [], []>} : vector<1x32xf32>, vector<32x32xf32>, vector<1x32xf32> -> vector<1x32xf32>
    %239 = arith.addf %237, %238 : vector<1x32xf32>
    %240 = math.tanh %239 : vector<1x32xf32>
    %c1_59 = arith.constant 1 : index
    %241 = memref.load %arg1[%c1_59] : memref<2xi32, #tpu.memory_space<smem>>
    %c6_i32_60 = arith.constant 6 : i32
    %242 = arith.cmpi sgt, %241, %c6_i32_60 : i32
    %243 = arith.extui %242 : i1 to i32
    %244 = arith.sitofp %243 : i32 to f32
    %245 = vector.broadcast %244 : f32 to vector<1x32xf32>
    %246 = arith.mulf %245, %240 : vector<1x32xf32>
    %cst_61 = arith.constant 1.000000e+00 : f32
    %247 = arith.subf %cst_61, %244 : f32
    %248 = vector.broadcast %247 : f32 to vector<1x32xf32>
    %249 = arith.mulf %248, %234 : vector<1x32xf32>
    %250 = arith.addf %246, %249 : vector<1x32xf32>
    %251 = vector.broadcast %244 : f32 to vector<1x32xf32>
    %252 = arith.mulf %251, %240 : vector<1x32xf32>
    %253 = vector.extract_strided_slice %139 {offsets = [7, 0], sizes = [1, 32], strides = [1, 1]} : vector<8x32xf32> to vector<1x32xf32>
    %cst_62 = arith.constant dense<0.000000e+00> : vector<1x32xf32>
    %254 = tpu.matmul %250, %13, %cst_62 {dimension_numbers = #tpu.dot_dimension_numbers<[1], [0], [0], [1], [0, 0, 1, 1], [], []>} : vector<1x32xf32>, vector<32x32xf32>, vector<1x32xf32> -> vector<1x32xf32>
    %255 = arith.addf %253, %254 : vector<1x32xf32>
    %256 = math.tanh %255 : vector<1x32xf32>
    %c1_63 = arith.constant 1 : index
    %257 = memref.load %arg1[%c1_63] : memref<2xi32, #tpu.memory_space<smem>>
    %c7_i32_64 = arith.constant 7 : i32
    %258 = arith.cmpi sgt, %257, %c7_i32_64 : i32
    %259 = arith.extui %258 : i1 to i32
    %260 = arith.sitofp %259 : i32 to f32
    %261 = vector.broadcast %260 : f32 to vector<1x32xf32>
    %262 = arith.mulf %261, %256 : vector<1x32xf32>
    %263 = tpu.concatenate %156, %172, %188, %204, %220, %236, %252, %262 in 0 : vector<1x32xf32>, vector<1x32xf32>, vector<1x32xf32>, vector<1x32xf32>, vector<1x32xf32>, vector<1x32xf32>, vector<1x32xf32>, vector<1x32xf32> -> vector<8x32xf32>
    %264 = tpu.concatenate %138, %263 in 0 : vector<8x32xf32>, vector<8x32xf32> -> vector<16x32xf32>
    %c0_65 = arith.constant 0 : index
    %c0_66 = arith.constant 0 : index
    %265 = vector.load %arg7[%c0_65, %c0_66] : memref<32x128xf32, #tpu.memory_space<vmem>>, vector<32x128xf32>
    %cst_67 = arith.constant dense<0.000000e+00> : vector<16x128xf32>
    %266 = tpu.matmul %264, %265, %cst_67 {dimension_numbers = #tpu.dot_dimension_numbers<[1], [0], [0], [1], [0, 0, 1, 1], [], []>} : vector<16x32xf32>, vector<32x128xf32>, vector<16x128xf32> -> vector<16x128xf32>
    %c0_68 = arith.constant 0 : index
    %c0_69 = arith.constant 0 : index
    %267 = vector.load %arg8[%c0_68, %c0_69] : memref<1x128xf32, #tpu.memory_space<vmem>>, vector<1x128xf32>
    %268 = vector.broadcast %267 : vector<1x128xf32> to vector<16x128xf32>
    %269 = arith.addf %266, %268 : vector<16x128xf32>
    %c0_70 = arith.constant 0 : index
    %c0_71 = arith.constant 0 : index
    %270 = vector.load %arg9[%c0_70, %c0_71] : memref<16x128xf32, #tpu.memory_space<vmem>>, vector<16x128xf32>
    tpu.vector_store %arg9[%c0_70, %c0_71], %269 {strides = array<i32>} : memref<16x128xf32, #tpu.memory_space<vmem>>, vector<16x128xf32>,
    return
  }
  func.func @transform_0(%arg0: i32, %arg1: memref<2xi32, #tpu.memory_space<smem>>) -> (i32, i32) {
    %c0_i32 = arith.constant 0 : i32
    %c0_i32_0 = arith.constant 0 : i32
    %c0_i32_1 = arith.constant 0 : i32
    return %c0_i32, %c0_i32_0 : i32, i32
  }
  func.func @transform_1(%arg0: i32, %arg1: memref<2xi32, #tpu.memory_space<smem>>) -> (i32, i32) {
    %c0_i32 = arith.constant 0 : i32
    %c0_i32_0 = arith.constant 0 : i32
    %c0_i32_1 = arith.constant 0 : i32
    return %c0_i32, %c0_i32_0 : i32, i32
  }
  func.func @transform_2(%arg0: i32, %arg1: memref<2xi32, #tpu.memory_space<smem>>) -> (i32, i32) {
    %c0_i32 = arith.constant 0 : i32
    %c0_i32_0 = arith.constant 0 : i32
    %c0_i32_1 = arith.constant 0 : i32
    return %c0_i32, %c0_i32_0 : i32, i32
  }
  func.func @transform_3(%arg0: i32, %arg1: memref<2xi32, #tpu.memory_space<smem>>) -> (i32, i32) {
    %c0_i32 = arith.constant 0 : i32
    %c0_i32_0 = arith.constant 0 : i32
    %c0_i32_1 = arith.constant 0 : i32
    return %c0_i32, %c0_i32_0 : i32, i32
  }
  func.func @transform_4(%arg0: i32, %arg1: memref<2xi32, #tpu.memory_space<smem>>) -> (i32, i32) {
    %c0_i32 = arith.constant 0 : i32
    %c0_i32_0 = arith.constant 0 : i32
    %c0_i32_1 = arith.constant 0 : i32
    return %c0_i32, %c0_i32_0 : i32, i32
  }
  func.func @transform_5(%arg0: i32, %arg1: memref<2xi32, #tpu.memory_space<smem>>) -> (i32, i32) {
    %c0_i32 = arith.constant 0 : i32
    %c0_i32_0 = arith.constant 0 : i32
    %c0_i32_1 = arith.constant 0 : i32
    return %c0_i32, %c0_i32_0 : i32, i32
  }
  func.func @transform_6(%arg0: i32, %arg1: memref<2xi32, #tpu.memory_space<smem>>) -> (i32, i32) {
    %c0_i32 = arith.constant 0 : i32
    %c0_i32_0 = arith.constant 0 : i32
    %c0_i32_1 = arith.constant 0 : i32
    return %c0_i32, %c0_i32_0 : i32, i32
  }
  func.func @transform_7(%arg0: i32, %arg1: memref<2xi32, #tpu.memory_space<smem>>) -> (i32, i32) {
    %c0_i32 = arith.constant 0 : i32
    %c0_i32_0 = arith.constant 0 : i32
    %c0_i32_1 = arith.constant 0 : i32
    return %c0_i32, %c0_i32_0 : i32, i32
  }
}

</mosaic_0001>

<bundles_post_ra>
// kernel: language_model_forward.1
= control target key start
LH: loop header
LB: loop body
LE: loop exit
PB: predicated region body
PF: predicated region fallthrough
CT: control target
= control target key end

     0   :  { %s921_s30 = smov [#allocation3]   ;;  %s1231_s0 = inlined_call_operand.vmem [shape: s32[2], index: 0, kind: input, shape index: {}]   ;;  %s1232_s1 = inlined_call_operand.vmem [shape: s32[16,1], index: 1, kind: input, shape index: {}]   ;;  %s1233_s2 = inlined_call_operand.vmem [shape: f32[128,32], index: 2, kind: input, shape index: {}]   ;;  %s1234_s3 = inlined_call_operand.vmem [shape: f32[32,32], index: 3, kind: input, shape index: {}]   ;;  %s1235_s4 = inlined_call_operand.vmem [shape: f32[32,32], index: 4, kind: input, shape index: {}]   ;;  %s1236_s5 = inlined_call_operand.vmem [shape: f32[1,32], index: 5, kind: input, shape index: {}]   ;;  %s1237_s6 = inlined_call_operand.vmem [shape: f32[32,128], index: 6, kind: input, shape index: {}]   ;;  %s1238_s7 = inlined_call_operand.vmem [shape: f32[1,128], index: 7, kind: input, shape index: {}]   ;;  %s1239_s8 = inlined_call_operand.hbm [shape: f32[16,128], index: 8, kind: output, shape index: {}]  }
   0x1   :  { %s14_s29 = sshll.u32 %s1231_s0, 4  ;;  %s15_s29 = int_to_ptr.vmem [resolvable:$true] %s14_s29 }
   0x2   :  { %17 = dma.vmem_to_smem %s15_s29, 16, %s921_s30, [#allocation2] }
   0x3   :  { %917 = dma.done.wait [#allocation2], 16 }
   0x4   :  { %918 = vsyncadd [#allocation2], 4294967280 }
   0x5   :  { %20 = sfence }
   0x6   :  { %v36_v0 = vld [vmem:[%s1232_s1] sm:$0xff]  ;;  %v67_v1 = vld [vmem:[%s1233_s2 + $0x78] sm:$0xff]  ;;  %v922_v2 = vmov 0   ;;  %v66_v3 = vld [vmem:[%s1233_s2 + $0x70] sm:$0xff] }
   0x7   :  { %846 = vset.pattern.permute.xlu0 %v922_v2  ;;  %68 = vmatpush.msra.mxu0 %v67_v1  ;;  %v65_v4 = vld [vmem:[%s1233_s2 + $0x68] sm:$0xff]  ;;  %v64_v5 = vld [vmem:[%s1233_s2 + $0x60] sm:$0xff]  ;;  %v63_v6 = vld [vmem:[%s1233_s2 + $0x58] sm:$0xff] }
   0x8   :  { %41 = vperm.xlu0 %846, %v36_v0  }
   0x9   :  { %69 = vmatpush.msra.mxu0 %v66_v3 }
   0xb   :  { %70 = vmatpush.msra.mxu0 %v65_v4 }
   0xc   :  { %21 = vsyncpa [#allocation5], 0  ;;  %v37_v7 = vld [vmem:[%s1232_s1 + $0x8] sm:$0xff]  ;;  %v62_v8 = vld [vmem:[%s1233_s2 + $0x50] sm:$0xff]  ;;  %v923_v26 = vmov 0.0   ;;  %v38_v27 = vlaneseq  ;;  %v924_v30 = vmov 1.0  }
   0xd   :  { %71 = vmatpush.msra.mxu0 %v64_v5  ;;  %v61_v9 = vld [vmem:[%s1233_s2 + $0x48] sm:$0xff]  ;;  %v60_v10 = vld [vmem:[%s1233_s2 + $0x40] sm:$0xff]  ;;  %v59_v11 = vld [vmem:[%s1233_s2 + $0x38] sm:$0xff]  ;;  %vm99_vm2 = vcmask 261120   ;;  %vm447_vm3 = vcmask 1040384   ;;  %vm449_vm4 = vcmask 1041408  }
   0xe   :  { %v58_v12 = vld [vmem:[%s1233_s2 + $0x30] sm:$0xff]  ;;  %v57_v13 = vld [vmem:[%s1233_s2 + $0x28] sm:$0xff]  ;;  %v56_v14 = vld [vmem:[%s1233_s2 + $0x20] sm:$0xff]  ;;  %v39_v28 = vand.u32 127, %v38_v27  ;;  %vm451_vm5 = vcmask 1042432   ;;  %s1141_s23 = sld [smem:[#allocation3 + $0x1]] }
   0xf   :  { %72 = vmatpush.msra.mxu0 %v63_v6  ;;  %v55_v15 = vld [vmem:[%s1233_s2 + $0x18] sm:$0xff]  ;;  %v54_v16 = vld [vmem:[%s1233_s2 + $0x10] sm:$0xff]  ;;  %v53_v17 = vld [vmem:[%s1233_s2 + $0x8] sm:$0xff]  ;;  %vm453_vm6 = vcmask 1043456   ;;  %vm455_vm7 = vcmask 1044480   ;;  %vm457_vm8 = vcmask 1045504  }
  0x10   :  { %44 = vperm.xlu0 %846, %v37_v7   ;;  %v52_v18 = vld [vmem:[%s1233_s2] sm:$0xff]  ;;  %v1033_v19 = vld [vmem:[%s1235_s4 + $0x18] sm:$0xff]  ;;  %v1038_v20 = vld [vmem:[%s1235_s4 + $0x10] sm:$0xff]  ;;  %vm459_vm9 = vcmask 1046528  }
  0x11   :  { %73 = vmatpush.msra.mxu0 %v62_v8  ;;  %v94_v21 = vld [vmem:[%s1234_s3 + $0x18] sm:$0xff]  ;;  %148 = vmatpush.msra.mxu3 %v1033_v19  ;;  %v93_v22 = vld [vmem:[%s1234_s3 + $0x10] sm:$0xff]  ;;  %v1050_v23 = vld [vmem:[%s1235_s4 + $0x8] sm:$0xff] }
  0x12   :  { %118 = vmatpush.msra.mxu1 %v94_v21  ;;  %v92_v24 = vld [vmem:[%s1234_s3 + $0x8] sm:$0xff]  ;;  %224 = vmatpush.msra.mxu2 %v1033_v19  ;;  %v1061_v25 = vld [vmem:[%s1235_s4] sm:$0xff] }
  0x13   :  { %74 = vmatpush.msra.mxu0 %v61_v9  ;;  %149 = vmatpush.msra.mxu3 %v1038_v20  ;;  %v91_v32 = vld [vmem:[%s1234_s3] sm:$0xff]  ;;  %s1096_s3 = sld [smem:[#allocation3]] }
  0x14   :  { %119 = vmatpush.msra.mxu1 %v93_v22  ;;  %225 = vmatpush.msra.mxu2 %v1038_v20  ;;  %v1102_v35 = vld [vmem:[%s1236_s5] ss:$0 sm:$0xff]  ;;  %p464_p5 = scmp.gt.s32.totalorder %s1141_s23, 0  ;;  %p501_p7 = scmp.gt.s32.totalorder %s1141_s23, 1 }
  0x15   :  { %75 = vmatpush.msra.mxu0 %v60_v10  ;;  %150 = vmatpush.msra.mxu3 %v1050_v23  ;;  %p542_p9 = scmp.gt.s32.totalorder %s1141_s23, 2  ;;  %p583_p10 = scmp.gt.s32.totalorder %s1141_s23, 3 }
  0x16   :  { %120 = vmatpush.msra.mxu1 %v92_v24  ;;  %226 = vmatpush.msra.mxu2 %v1050_v23  ;;  %s465_s2 = scalar_select %p464_p5, 1, 0 }
  0x17   :  { %76 = vmatpush.msra.mxu0 %v59_v11  ;;  %151 = vmatpush.msra.mxu3 %v1061_v25  ;;  %s502_s30 = scalar_select %p501_p7, 1, 0 }
  0x18   :  { %152 = vmatmul.f32.vlgmr.msra.gmra.mxu3 %v923_v26  ;;  %227 = vmatpush.msra.mxu2 %v1061_v25  ;;  %s466_s27 = scvt.s32.f32 %s465_s2  ;;  %p624_p12 = scmp.gt.s32.totalorder %s1141_s23, 4 }
  0x19   :  { %77 = vmatpush.msra.mxu0 %v58_v12  ;;  %183 = vmatpush.msrb.mxu3 %v1033_v19  ;;  %p159_p0 = scmp.gt.s32.totalorder %s1096_s3, 0  ;;  %p196_p1 = scmp.gt.s32.totalorder %s1096_s3, 1 }
  0x1a   :  { %347 = vmatpush.msrb.mxu2 %v1033_v19  ;;  %121 = vmatpush.msra.mxu1 %v91_v32  ;;  %p237_p2 = scmp.gt.s32.totalorder %s1096_s3, 2  ;;  %p278_p3 = scmp.gt.s32.totalorder %s1096_s3, 3 }
  0x1b   :  { %78 = vmatpush.msra.mxu0 %v57_v13  ;;  %184 = vmatpush.msrb.mxu3 %v1038_v20  ;;  %s160_s11 = scalar_select %p159_p0, 1, 0 }
  0x1c   :  { %348 = vmatpush.msrb.mxu2 %v1038_v20  ;;  %306 = vmatpush.msrb.mxu1 %v1033_v19  ;;  %s197_s5 = scalar_select %p196_p1, 1, 0 }
  0x1d   :  { %79 = vmatpush.msra.mxu0 %v56_v14  ;;  %185 = vmatpush.msrb.mxu3 %v1050_v23  ;;  %s161_s14 = scvt.s32.f32 %s160_s11  ;;  %p319_p4 = scmp.gt.s32.totalorder %s1096_s3, 4 }
  0x1e   :  { %349 = vmatpush.msrb.mxu2 %v1050_v23  ;;  %307 = vmatpush.msrb.mxu1 %v1038_v20  ;;  %s198_s15 = scvt.s32.f32 %s197_s5  ;;  %s469_s28 = ssub.f32 1.0, %s466_s27 }
  0x1f   :  { %80 = vmatpush.msra.mxu0 %v55_v15  ;;  %186 = vmatpush.msrb.mxu3 %v1061_v25  ;;  %s164_s0 = ssub.f32 1.0, %s161_s14  ;;  %v162_v41 = vstv %s161_s14  ;;  %p360_p6 = scmp.gt.s32.totalorder %s1096_s3, 5 }
  0x20   :  { %350 = vmatpush.msrb.mxu2 %v1061_v25  ;;  %308 = vmatpush.msrb.mxu1 %v1050_v23  ;;  %s201_s16 = ssub.f32 1.0, %s198_s15  ;;  %v199_v51 = vstv %s198_s15  ;;  %s503_s4 = scvt.s32.f32 %s502_s30 }
  0x21   :  { %81 = vmatpush.msra.mxu0 %v54_v16  ;;  %265 = vmatpush.msra.mxu3 %v1033_v19  ;;  %v165_v40 = vstv %s164_s0  ;;  %s238_s17 = scalar_select %p237_p2, 1, 0 }
  0x22   :  { %309 = vmatpush.msrb.mxu1 %v1061_v25  ;;  %v166_v42 = vmul.f32 0.0, %v165_v40  ;;  %v202_v49 = vstv %s201_s16  ;;  %s279_s20 = scalar_select %p278_p3, 1, 0  ;;  %v467_v40 = vstv %s466_s27 }
  0x23   :  { %82 = vmatpush.msra.mxu0 %v53_v17  ;;  %266 = vmatpush.msra.mxu3 %v1038_v20  ;;  %s239_s18 = scvt.s32.f32 %s238_s17  ;;  %s506_s10 = ssub.f32 1.0, %s503_s4 }
  0x24   :  { %s280_s21 = scvt.s32.f32 %s279_s20  ;;  %p401_p8 = scmp.gt.s32.totalorder %s1096_s3, 6 }
  0x25   :  { %83 = vmatpush.msra.mxu0 %v52_v18  ;;  %267 = vmatpush.msra.mxu3 %v1050_v23  ;;  %s242_s19 = ssub.f32 1.0, %s239_s18  ;;  %v240_v62 = vstv %s239_s18  ;;  %p442_p11 = scmp.gt.s32.totalorder %s1096_s3, 7 }
  0x26   :  { %s283_s22 = ssub.f32 1.0, %s280_s21  ;;  %v281_v11 = vstv %s280_s21  ;;  %p665_p13 = scmp.gt.s32.totalorder %s1141_s23, 5 }
  0x27   :  { %693 = vmatpush.msrb.mxu0 %v1033_v19  ;;  %268 = vmatpush.msra.mxu3 %v1061_v25  ;;  %v243_v60 = vstv %s242_s19  ;;  %s320_s24 = scalar_select %p319_p4, 1, 0 }
  0x28   :  { %v284_v9 = vstv %s283_s22  ;;  %s361_s29 = scalar_select %p360_p6, 1, 0 }
  0x29   :  { %694 = vmatpush.msrb.mxu0 %v1038_v20  ;;  %s321_s25 = scvt.s32.f32 %s320_s24  ;;  %p706_p0 = scmp.gt.s32.totalorder %s1141_s23, 6 }
  0x2a   :  { %s362_s1 = scvt.s32.f32 %s361_s29  ;;  %p747_p1 = scmp.gt.s32.totalorder %s1141_s23, 7 }
  0x2b   :  { %695 = vmatpush.msrb.mxu0 %v1050_v23  ;;  %s324_s26 = ssub.f32 1.0, %s321_s25  ;;  %s804_s23 = sshll.u32 %s1239_s8, 4  ;;  %s805_s23 = int_to_ptr.hbm [resolvable:$true] %s804_s23 }
  0x2c   :  { %s365_s9 = ssub.f32 1.0, %s362_s1  ;;  %s926_s16 = smov 128  }
  0x2d   :  { %696 = vmatpush.msrb.mxu0 %v1061_v25  ;;  %v325_v27 = vstv %s324_s26  ;;  %s402_s11 = scalar_select %p401_p8, 1, 0 }
  0x2e   :  { %s543_s14 = scalar_select %p542_p9, 1, 0 }
  0x2f   :  { %s403_s12 = scvt.s32.f32 %s402_s11  ;;  %s927_s17 = smov 8  }
  0x30   :  { %s544_s0 = scvt.s32.f32 %s543_s14  ;;  %s925_s14 = smov [#allocation4]  }
  0x31   :  { %s406_s13 = ssub.f32 1.0, %s403_s12 }
  0x32   :  { %s547_s5 = ssub.f32 1.0, %s544_s0 }
  0x33   :  { %s584_s24 = scalar_select %p583_p10, 1, 0 }
  0x34   :  { %s443_s2 = scalar_select %p442_p11, 1, 0 }
  0x35   :  { %s625_s3 = scalar_select %p624_p12, 1, 0 }
  0x36   :  { %s666_s30 = scalar_select %p665_p13, 1, 0 }
  0x37   :  { %s626_s27 = scvt.s32.f32 %s625_s3 }
  0x7a   :  { %v42_v29 = vpop.permute.xlu0 %41 }
  0x7b   :  { %vm46_vm0 = vcmp.eq.s32.totalorder %v39_v28, %v42_v29 }
  0x7c   :  { %818 = vmatmul.msk.f32.vlgmr.msra.gmra.mxu0 %vm46_vm0, %v924_v30 }
  0x82   :  { %v45_v31 = vpop.permute.xlu0 %44 }
  0x83   :  { %vm47_vm1 = vcmp.eq.s32.totalorder %v39_v28, %v45_v31 }
  0x84   :  { %819 = vmatmul.msk.f32.gmra.mxu0 %vm47_vm1, %v924_v30  ;;  %v322_v30 = vstv %s321_s25  ;;  %s585_s25 = scvt.s32.f32 %s584_s24 }
  0x86   :  { %s588_s26 = ssub.f32 1.0, %s585_s25 }
  0x9b   :  { %v1104_v37 = vpop.f32.mrf.mxu3 }
  0xf9   :  { %v85_v33 = vpop.f32.mrf.mxu0 }
  0xfa   :  { %820 = vmatmul.msk.f32.vlgmr.msra.gmra.mxu1 %vm99_vm2, %v85_v33 }
  0xfb   :  { %429 = vmatpush.msra.mxu1 %v1033_v19 }
  0xfd   :  { %430 = vmatpush.msra.mxu1 %v1038_v20 }
  0xff   :  { %431 = vmatpush.msra.mxu1 %v1050_v23 }
 0x101   :  { %v88_v34 = vpop.f32.mrf.mxu0  ;;  %432 = vmatpush.msra.mxu1 %v1061_v25 }
 0x102   :  { %821 = vmatmul.msk.f32.gmra.mxu1 %vm99_vm2, %v88_v34 }
 0x177   :  { %v123_v36 = vpop.f32.mrf.mxu1 }
 0x178   :  { %v1107_v38 = vadd.f32 %v1102_v35, %v123_v36 }
 0x17a   :  { %v156_v39 = vadd.f32 %v1104_v37, %v1107_v38 }
 0x17c   :  { %849 = vtanh.f32 %v156_v39 }
 0x17f   :  { %v126_v18 = vpop.f32.mrf.mxu1 }
 0x180   :  { %v1145_v24 = vadd.f32 %v1102_v35, %v126_v18 }
 0x182   :  { %v850_v43 = vpop.eup %849  ;;  %v461_v28 = vadd.f32 %v1104_v37, %v1145_v24 }
 0x183   :  { %v163_v44 = vmul.f32 %v850_v43, %v162_v41  ;;  %v470_v41 = vstv %s469_s28  ;;  %s629_s28 = ssub.f32 1.0, %s626_s27 }
 0x185   :  { %v167_v45 = vadd.f32 %v166_v42, %v163_v44  ;;  %v471_v42 = vmul.f32 0.0, %v470_v41 }
 0x187   :  { %822 = vmatmul.msk.f32.vlgmr.msrb.gmra.mxu3 %vm99_vm2, %v167_v45  ;;  %v203_v50 = vmul.f32 %v202_v49, %v167_v45 }
 0x188   :  { %388 = vmatpush.msrb.mxu3 %v1033_v19 }
 0x189   :  { %v205_v54 = vrot.slane %v203_v50, 7  ;;  %v363_v50 = vstv %s362_s1 }
 0x18a   :  { %389 = vmatpush.msrb.mxu3 %v1038_v20 }
 0x18c   :  { %390 = vmatpush.msrb.mxu3 %v1050_v23 }
 0x18e   :  { %391 = vmatpush.msrb.mxu3 %v1061_v25 }
 0x20a   :  { %v188_v46 = vpop.f32.mrf.mxu3 }
 0x20b   :  { %v192_v47 = vrot.slane %v188_v46, 7 }
 0x20d   :  { %v194_v48 = vadd.f32 %v192_v47, %v1107_v38  ;;  %v366_v47 = vstv %s365_s9  ;;  %s667_s9 = scvt.s32.f32 %s666_s30 }
 0x20f   :  { %851 = vtanh.f32 %v194_v48 }
 0x215   :  { %v852_v52 = vpop.eup %851 }
 0x216   :  { %v200_v53 = vmul.f32 %v852_v52, %v199_v51 }
 0x218   :  { %v207_v55 = vadd.f32 %v205_v54, %v200_v53  ;;  %v448_v2 = vsel %vm447_vm3, %v163_v44, %v200_v53 }
 0x21a   :  { %v209_v56 = vrot.slane %v207_v55, 1  ;;  %v244_v61 = vmul.f32 %v243_v60, %v207_v55 }
 0x21c   :  { %823 = vmatmul.msk.f32.vlgmr.msra.gmra.mxu2 %vm99_vm2, %v209_v56  ;;  %v246_v0 = vrot.slane %v244_v61, 7  ;;  %v507_v56 = vstv %s506_s10  ;;  %v504_v61 = vstv %s503_s4  ;;  %s707_s4 = scalar_select %p706_p0, 1, 0 }
 0x21d   :  { %488 = vmatpush.msra.mxu2 %v1033_v19 }
 0x21e   :  { %s708_s10 = scvt.s32.f32 %s707_s4 }
 0x21f   :  { %489 = vmatpush.msra.mxu2 %v1038_v20 }
 0x220   :  { %s711_s11 = ssub.f32 1.0, %s708_s10 }
 0x221   :  { %490 = vmatpush.msra.mxu2 %v1050_v23 }
 0x223   :  { %491 = vmatpush.msra.mxu2 %v1061_v25 }
 0x29f   :  { %v229_v57 = vpop.f32.mrf.mxu2 }
 0x2a0   :  { %v233_v58 = vrot.slane %v229_v57, 6 }
 0x2a2   :  { %v235_v59 = vadd.f32 %v233_v58, %v1107_v38 }
 0x2a4   :  { %853 = vtanh.f32 %v235_v59 }
 0x2aa   :  { %v854_v63 = vpop.eup %853 }
 0x2ab   :  { %v241_v1 = vmul.f32 %v854_v63, %v240_v62 }
 0x2ad   :  { %v248_v3 = vadd.f32 %v246_v0, %v241_v1  ;;  %v450_v4 = vsel %vm449_vm4, %v448_v2, %v241_v1 }
 0x2af   :  { %v250_v5 = vrot.slane %v248_v3, 2  ;;  %v285_v10 = vmul.f32 %v284_v9, %v248_v3  ;;  %v404_v9 = vstv %s403_s12  ;;  %s748_s12 = scalar_select %p747_p1, 1, 0 }
 0x2b1   :  { %824 = vmatmul.msk.f32.vlgmr.msra.gmra.mxu3 %vm99_vm2, %v250_v5  ;;  %v287_v14 = vrot.slane %v285_v10, 7 }
 0x2b2   :  { %529 = vmatpush.msra.mxu3 %v1033_v19 }
 0x2b4   :  { %530 = vmatpush.msra.mxu3 %v1038_v20 }
 0x2b6   :  { %531 = vmatpush.msra.mxu3 %v1050_v23 }
 0x2b8   :  { %532 = vmatpush.msra.mxu3 %v1061_v25 }
 0x334   :  { %v270_v6 = vpop.f32.mrf.mxu3 }
 0x335   :  { %v274_v7 = vrot.slane %v270_v6, 5  ;;  %v407_v6 = vstv %s406_s13  ;;  %s749_s13 = scvt.s32.f32 %s748_s12 }
 0x337   :  { %v276_v8 = vadd.f32 %v274_v7, %v1107_v38 }
 0x339   :  { %855 = vtanh.f32 %v276_v8 }
 0x33f   :  { %v856_v12 = vpop.eup %855 }
 0x340   :  { %v282_v13 = vmul.f32 %v856_v12, %v281_v11 }
 0x342   :  { %v452_v15 = vsel %vm451_vm5, %v450_v4, %v282_v13  ;;  %v289_v16 = vadd.f32 %v287_v14, %v282_v13 }
 0x344   :  { %v291_v17 = vrot.slane %v289_v16, 3  ;;  %v326_v29 = vmul.f32 %v325_v27, %v289_v16 }
 0x346   :  { %825 = vmatmul.msk.f32.vlgmr.msrb.gmra.mxu1 %vm99_vm2, %v291_v17  ;;  %v328_v33 = vrot.slane %v326_v29, 7 }
 0x347   :  { %570 = vmatpush.msrb.mxu1 %v1033_v19 }
 0x349   :  { %571 = vmatpush.msrb.mxu1 %v1038_v20 }
 0x34b   :  { %572 = vmatpush.msrb.mxu1 %v1050_v23 }
 0x34d   :  { %573 = vmatpush.msrb.mxu1 %v1061_v25 }
 0x3c3   :  { %v311_v21 = vpop.f32.mrf.mxu1 }
 0x3c4   :  { %v315_v22 = vrot.slane %v311_v21, 4 }
 0x3c6   :  { %v317_v26 = vadd.f32 %v315_v22, %v1107_v38  ;;  %v545_v22 = vstv %s544_s0  ;;  %s802_s0 = sshll.u32 %s925_s14, 4  ;;  %s803_s0 = int_to_ptr.vmem [resolvable:$true] %s802_s0 }
 0x3c8   :  { %857 = vtanh.f32 %v317_v26 }
 0x3c9   :  { %859 = vtanh.f32 %v461_v28 }
 0x3ce   :  { %v858_v31 = vpop.eup %857 }
 0x3cf   :  { %v323_v32 = vmul.f32 %v858_v31, %v322_v30  ;;  %v860_v39 = vpop.eup %859 }
 0x3d0   :  { %v1153_v37 = vmul.f32 %v860_v39, %v467_v40  ;;  %v589_v40 = vstv %s588_s26 }
 0x3d1   :  { %v330_v34 = vadd.f32 %v328_v33, %v323_v32  ;;  %v454_v35 = vsel %vm453_vm6, %v452_v15, %v323_v32  ;;  %v548_v15 = vstv %s547_s5  ;;  %v761_v33 = vld [vmem:[%s1237_s6 + $0x10] sm:$0xff] }
 0x3d2   :  { %v472_v43 = vadd.f32 %v471_v42, %v1153_v37  ;;  %v586_v42 = vstv %s585_s25 }
 0x3d3   :  { %v332_v36 = vrot.slane %v330_v34, 4  ;;  %v367_v48 = vmul.f32 %v366_v47, %v330_v34 }
 0x3d4   :  { %v508_v59 = vmul.f32 %v507_v56, %v472_v43  ;;  %v1210_v56 = vld [vmem:[%s1238_s7] ss:$0 sm:$0xff]  ;;  %s670_s7 = ssub.f32 1.0, %s667_s9 }
 0x3d5   :  { %826 = vmatmul.msk.f32.vlgmr.msrb.gmra.mxu2 %vm99_vm2, %v332_v36  ;;  %v369_v54 = vrot.slane %v367_v48, 7 }
 0x3d6   :  { %611 = vmatpush.msrb.mxu2 %v1033_v19  ;;  %v510_v0 = vrot.slane %v508_v59, 7  ;;  %v627_v59 = vstv %s626_s27 }
 0x3d8   :  { %612 = vmatpush.msrb.mxu2 %v1038_v20 }
 0x3da   :  { %613 = vmatpush.msrb.mxu2 %v1050_v23 }
 0x3dc   :  { %614 = vmatpush.msrb.mxu2 %v1061_v25 }
 0x3dd   :  { %830 = vmatmul.msk.f32.vlgmr.msra.gmra.mxu2 %vm99_vm2, %v472_v43 }
 0x458   :  { %v352_v44 = vpop.f32.mrf.mxu2 }
 0x459   :  { %v356_v45 = vrot.slane %v352_v44, 3 }
 0x45b   :  { %v358_v46 = vadd.f32 %v356_v45, %v1107_v38 }
 0x45d   :  { %861 = vtanh.f32 %v358_v46 }
 0x460   :  { %v493_v49 = vpop.f32.mrf.mxu2 }
 0x461   :  { %v497_v51 = vrot.slane %v493_v49, 7 }
 0x463   :  { %v862_v52 = vpop.eup %861  ;;  %v499_v53 = vadd.f32 %v497_v51, %v1145_v24 }
 0x464   :  { %v364_v55 = vmul.f32 %v862_v52, %v363_v50 }
 0x465   :  { %863 = vtanh.f32 %v499_v53 }
 0x466   :  { %v371_v57 = vadd.f32 %v369_v54, %v364_v55  ;;  %v456_v58 = vsel %vm455_vm7, %v454_v35, %v364_v55  ;;  %v630_v55 = vstv %s629_s28 }
 0x468   :  { %v373_v60 = vrot.slane %v371_v57, 5  ;;  %v408_v7 = vmul.f32 %v407_v6, %v371_v57  ;;  %v671_v6 = vstv %s670_s7 }
 0x46a   :  { %827 = vmatmul.msk.f32.vlgmr.msrb.gmra.mxu3 %vm99_vm2, %v373_v60  ;;  %v410_v14 = vrot.slane %v408_v7, 7 }
 0x46b   :  { %v864_v62 = vpop.eup %863  ;;  %652 = vmatpush.msrb.mxu3 %v1033_v19 }
 0x46c   :  { %v505_v63 = vmul.f32 %v864_v62, %v504_v61 }
 0x46d   :  { %653 = vmatpush.msrb.mxu3 %v1038_v20 }
 0x46e   :  { %v512_v1 = vadd.f32 %v510_v0, %v505_v63  ;;  %v752_v29 = vsel %vm447_vm3, %v1153_v37, %v505_v63 }
 0x46f   :  { %654 = vmatpush.msrb.mxu3 %v1050_v23 }
 0x470   :  { %v514_v2 = vrot.slane %v512_v1, 1  ;;  %v549_v18 = vmul.f32 %v548_v15, %v512_v1 }
 0x471   :  { %655 = vmatpush.msrb.mxu3 %v1061_v25 }
 0x472   :  { %831 = vmatmul.msk.f32.vlgmr.msra.gmra.mxu3 %vm99_vm2, %v514_v2  ;;  %v551_v28 = vrot.slane %v549_v18, 7  ;;  %v712_v18 = vstv %s711_s11 }
 0x4ed   :  { %v393_v3 = vpop.f32.mrf.mxu3 }
 0x4ee   :  { %v397_v4 = vrot.slane %v393_v3, 2 }
 0x4f0   :  { %v399_v5 = vadd.f32 %v397_v4, %v1107_v38 }
 0x4f2   :  { %865 = vtanh.f32 %v399_v5 }
 0x4f5   :  { %v534_v8 = vpop.f32.mrf.mxu3 }
 0x4f6   :  { %v538_v10 = vrot.slane %v534_v8, 6  ;;  %v668_v8 = vstv %s667_s9 }
 0x4f8   :  { %v866_v11 = vpop.eup %865  ;;  %v540_v12 = vadd.f32 %v538_v10, %v1145_v24 }
 0x4f9   :  { %v405_v13 = vmul.f32 %v866_v11, %v404_v9 }
 0x4fa   :  { %867 = vtanh.f32 %v540_v12 }
 0x4fb   :  { %v412_v16 = vadd.f32 %v410_v14, %v405_v13  ;;  %v458_v17 = vsel %vm457_vm8, %v456_v58, %v405_v13 }
 0x4fd   :  { %v414_v21 = vrot.slane %v412_v16, 6 }
 0x4ff   :  { %828 = vmatmul.msk.f32.vlgmr.msra.gmra.mxu1 %vm99_vm2, %v414_v21 }
 0x500   :  { %v868_v26 = vpop.eup %867  ;;  %734 = vmatpush.msra.mxu1 %v1033_v19  ;;  %v762_v19 = vld [vmem:[%s1237_s6 + $0x18] sm:$0xff] }
 0x501   :  { %v546_v27 = vmul.f32 %v868_v26, %v545_v22  ;;  %785 = vmatpush.msra.mxu2 %v762_v19  ;;  %v709_v22 = vstv %s708_s10 }
 0x502   :  { %735 = vmatpush.msra.mxu1 %v1038_v20  ;;  %v760_v20 = vld [vmem:[%s1237_s6 + $0x8] sm:$0xff] }
 0x503   :  { %v553_v30 = vadd.f32 %v551_v28, %v546_v27  ;;  %v753_v31 = vsel %vm449_vm4, %v752_v29, %v546_v27  ;;  %786 = vmatpush.msra.mxu2 %v761_v33 }
 0x504   :  { %736 = vmatpush.msra.mxu1 %v1050_v23  ;;  %v759_v23 = vld [vmem:[%s1237_s6] sm:$0xff]  ;;  %s444_s6 = scvt.s32.f32 %s443_s2 }
 0x505   :  { %v555_v32 = vrot.slane %v553_v30, 2  ;;  %787 = vmatpush.msra.mxu2 %v760_v20  ;;  %v590_v37 = vmul.f32 %v589_v40, %v553_v30  ;;  %v750_v20 = vstv %s749_s13 }
 0x506   :  { %737 = vmatpush.msra.mxu1 %v1061_v25  ;;  %v445_v50 = vstv %s444_s6 }
 0x507   :  { %832 = vmatmul.msk.f32.vlgmr.msrb.gmra.mxu1 %vm99_vm2, %v555_v32  ;;  %788 = vmatpush.msra.mxu2 %v759_v23  ;;  %v592_v45 = vrot.slane %v590_v37, 7 }
 0x57c   :  { %v434_v25 = vpop.f32.mrf.mxu1 }
 0x57d   :  { %v438_v39 = vrot.slane %v434_v25, 1 }
 0x57f   :  { %v440_v41 = vadd.f32 %v438_v39, %v1107_v38 }
 0x584   :  { %v575_v34 = vpop.f32.mrf.mxu1 }
 0x585   :  { %v579_v35 = vrot.slane %v575_v34, 5 }
 0x587   :  { %v581_v36 = vadd.f32 %v579_v35, %v1145_v24 }
 0x589   :  { %869 = vtanh.f32 %v581_v36 }
 0x58a   :  { %871 = vtanh.f32 %v440_v41 }
 0x58f   :  { %v870_v43 = vpop.eup %869 }
 0x590   :  { %v587_v44 = vmul.f32 %v870_v43, %v586_v42  ;;  %v872_v49 = vpop.eup %871 }
 0x591   :  { %v446_v51 = vmul.f32 %v872_v49, %v445_v50 }
 0x592   :  { %v594_v46 = vadd.f32 %v592_v45, %v587_v44  ;;  %v754_v47 = vsel %vm451_vm5, %v753_v31, %v587_v44 }
 0x593   :  { %v460_v38 = vsel %vm459_vm9, %v458_v17, %v446_v51 }
 0x594   :  { %v596_v48 = vrot.slane %v594_v46, 3  ;;  %v631_v57 = vmul.f32 %v630_v55, %v594_v46 }
 0x596   :  { %833 = vmatmul.msk.f32.vlgmr.msrb.gmra.mxu2 %vm99_vm2, %v596_v48  ;;  %v633_v63 = vrot.slane %v631_v57, 7 }
 0x59e   :  { %837 = vmatmul.msk.f32.vlgmr.msra.gmra.mxu2 %vm99_vm2, %v460_v38 }
 0x619   :  { %v616_v52 = vpop.f32.mrf.mxu2 }
 0x61a   :  { %v620_v53 = vrot.slane %v616_v52, 4 }
 0x61c   :  { %v622_v54 = vadd.f32 %v620_v53, %v1145_v24 }
 0x61e   :  { %873 = vtanh.f32 %v622_v54 }
 0x621   :  { %v790_v58 = vpop.f32.mrf.mxu2 }
 0x622   :  { %v791_v60 = vadd.f32 %v1210_v56, %v790_v58 }
 0x624   :  { %v874_v61 = vpop.eup %873  ;;  %796 = vst [vmem:[#allocation4] sm:$0xff] %v791_v60 }
 0x625   :  { %v628_v62 = vmul.f32 %v874_v61, %v627_v59 }
 0x627   :  { %v635_v0 = vadd.f32 %v633_v63, %v628_v62  ;;  %v755_v1 = vsel %vm453_vm6, %v754_v47, %v628_v62 }
 0x629   :  { %v637_v2 = vrot.slane %v635_v0, 4  ;;  %v672_v7 = vmul.f32 %v671_v6, %v635_v0 }
 0x62b   :  { %834 = vmatmul.msk.f32.vlgmr.msrb.gmra.mxu3 %vm99_vm2, %v637_v2  ;;  %v674_v11 = vrot.slane %v672_v7, 7 }
 0x6ae   :  { %v657_v3 = vpop.f32.mrf.mxu3 }
 0x6af   :  { %v661_v4 = vrot.slane %v657_v3, 3 }
 0x6b1   :  { %v663_v5 = vadd.f32 %v661_v4, %v1145_v24 }
 0x6b3   :  { %875 = vtanh.f32 %v663_v5 }
 0x6b9   :  { %v876_v9 = vpop.eup %875 }
 0x6ba   :  { %v669_v10 = vmul.f32 %v876_v9, %v668_v8 }
 0x6bc   :  { %v676_v12 = vadd.f32 %v674_v11, %v669_v10  ;;  %v756_v13 = vsel %vm455_vm7, %v755_v1, %v669_v10 }
 0x6be   :  { %v678_v14 = vrot.slane %v676_v12, 5  ;;  %v713_v21 = vmul.f32 %v712_v18, %v676_v12 }
 0x6c0   :  { %835 = vmatmul.msk.f32.vlgmr.msrb.gmra.mxu0 %vm99_vm2, %v678_v14  ;;  %v715_v27 = vrot.slane %v713_v21, 7 }
 0x73d   :  { %v698_v15 = vpop.f32.mrf.mxu0 }
 0x73e   :  { %v702_v16 = vrot.slane %v698_v15, 2 }
 0x740   :  { %v704_v17 = vadd.f32 %v702_v16, %v1145_v24 }
 0x742   :  { %877 = vtanh.f32 %v704_v17 }
 0x748   :  { %v878_v26 = vpop.eup %877 }
 0x749   :  { %v710_v28 = vmul.f32 %v878_v26, %v709_v22 }
 0x74b   :  { %v717_v29 = vadd.f32 %v715_v27, %v710_v28  ;;  %v757_v30 = vsel %vm457_vm8, %v756_v13, %v710_v28 }
 0x74d   :  { %v719_v31 = vrot.slane %v717_v29, 6 }
 0x74f   :  { %836 = vmatmul.msk.f32.vlgmr.msra.gmra.mxu1 %vm99_vm2, %v719_v31 }
 0x7cc   :  { %v739_v32 = vpop.f32.mrf.mxu1 }
 0x7cd   :  { %v743_v19 = vrot.slane %v739_v32, 1 }
 0x7cf   :  { %v745_v33 = vadd.f32 %v743_v19, %v1145_v24 }
 0x7d1   :  { %879 = vtanh.f32 %v745_v33 }
 0x7d7   :  { %v880_v23 = vpop.eup %879 }
 0x7d8   :  { %v751_v25 = vmul.f32 %v880_v23, %v750_v20 }
 0x7da   :  { %v758_v34 = vsel %vm459_vm9, %v757_v30, %v751_v25 }
 0x7db   :  { %838 = vmatmul.msk.f32.gmra.mxu2 %vm99_vm2, %v758_v34 }
 0x85e   :  { %v793_v35 = vpop.f32.mrf.mxu2 }
 0x85f   :  { %v794_v24 = vadd.f32 %v1210_v56, %v793_v35 }
 0x861   :  { %797 = vst [vmem:[#allocation4 + $0x8] sm:$0xff] %v794_v24 }
 0x862   :  { %810 = dma.vmem_to_hbm [thread:$0]  %s803_s0, 256, %s805_s23, [#allocation5], %s926_s16, %s926_s16, %s927_s17  }
 0x863   :  { %919 = dma.done.wait [#allocation5], 256  }
 0x864   :  { %920 = vsyncadd [#allocation5], 4294967040 }
 0x865   :  { %815 = vsyncpa [#allocation5], 1 }

</bundles_post_ra>
